<compile_context>
chip_gen: v7x
topology: tpu7x:2x2x1
jax: 0.10.0
libtpu: 0.0.40
codegen_flags: <defaults>
</compile_context>

<pallas_src>
import jax
import jax.numpy as jnp
from jax.experimental import pallas as pl
from jax.experimental.pallas import tpu as pltpu


def d_net_gauss_kernel(x_ref, w1_ref, b1_ref, w2_ref, b2_ref, w3_ref, b3_ref, o_ref):
    # lin1 + relu (dropout is identity in eval mode).  bf16 x bf16 -> f32 acc on the MXU.
    x_bf = x_ref[...].astype(jnp.bfloat16)
    h1 = jnp.dot(x_bf, w1_ref[...], preferred_element_type=jnp.float32)
    h1 = jnp.maximum(h1 + b1_ref[...], 0.0)

    # lin2 + relu
    h2 = jnp.dot(h1.astype(jnp.bfloat16), w2_ref[...], preferred_element_type=jnp.float32)
    h2 = jnp.maximum(h2 + b2_ref[...], 0.0)

    # lin3 (out_features == 1): elementwise mul + lane reduction keeps the (TB, 1)
    # output layout simple and uses the (idle) XLU instead of a wasteful 1-wide matmul.
    logits = jnp.sum(h2 * w3_ref[...], axis=-1, keepdims=True) + b3_ref[0, 0]

    # sigmoid: exp on the EUP, approx reciprocal also on the EUP.
    o_ref[...] = pl.reciprocal(1.0 + jnp.exp(-logits), approx=True)


def d_net_gauss(x, w1, b1, w2, b2, w3, b3, *, batch_tile=256):
    B, z_dim = x.shape
    N = w1.shape[1]
    assert w1.shape == (z_dim, N)
    assert w2.shape == (N, N)
    assert w3.shape == (1, N)            # row-vector form of the (N, 1) lin3 weight
    assert b1.shape == (1, N) and b2.shape == (1, N) and b3.shape == (1, 1)

    # Pad hidden width to a multiple of 128 so lane tiles are dense.  Padded hidden
    # units have zero weight/bias -> relu(0) = 0 -> exactly zero contribution.
    Np = ((N + 127) // 128) * 128
    if Np != N:
        pad = Np - N
        w1 = jnp.pad(w1, ((0, 0), (0, pad)))
        b1 = jnp.pad(b1, ((0, 0), (0, pad)))
        w2 = jnp.pad(w2, ((0, pad), (0, pad)))
        b2 = jnp.pad(b2, ((0, 0), (0, pad)))
        w3 = jnp.pad(w3, ((0, 0), (0, pad)))

    # Stream the two big weight matrices as bf16; everything else stays f32.
    w1 = w1.astype(jnp.bfloat16)
    w2 = w2.astype(jnp.bfloat16)
    x = x.astype(jnp.float32)
    b1 = b1.astype(jnp.float32)
    b2 = b2.astype(jnp.float32)
    w3 = w3.astype(jnp.float32)
    b3 = b3.astype(jnp.float32)

    # Batch tile: full batch if small, else `batch_tile` rows (multiple of 8 -> valid
    # sublane tiling; a partial last block is handled/masked by Pallas).
    TB = B if B <= batch_tile else batch_tile
    grid = (pl.cdiv(B, TB),)

    # Constant index_map -> block stays VMEM-resident across all grid steps (no re-DMA).
    resident = lambda shape: pl.BlockSpec(shape, lambda i: (0,) * len(shape))

    return pl.pallas_call(
        d_net_gauss_kernel,
        out_shape=jax.ShapeDtypeStruct((B, 1), jnp.float32),
        grid=grid,
        in_specs=[
            pl.BlockSpec((TB, z_dim), lambda i: (i, 0)),        # x: tiled over batch
            resident((z_dim, Np)),                              # W1 (bf16), resident
            resident((1, Np)),                                  # b1
            resident((Np, Np)),                                 # W2 (bf16), resident
            resident((1, Np)),                                  # b2
            resident((1, Np)),                                  # w3 (row vector)
            pl.BlockSpec(memory_space=pltpu.MemorySpace.SMEM),  # b3 scalar in SMEM
        ],
        out_specs=pl.BlockSpec((TB, 1), lambda i: (i, 0)),
        compiler_params=pltpu.CompilerParams(
            dimension_semantics=("parallel",),   # batch axis shards over v7x's 2 TCs
            vmem_limit_bytes=64 * 1024 * 1024,
        ),
    )(x, w1, b1, w2, b2, w3, b3)


def init_params(key, z_dim, N):
    """Deterministic PyTorch-nn.Linear-style init (uniform +/- 1/sqrt(fan_in))."""
    k1, k2, k3, k4, k5, k6 = jax.random.split(key, 6)

    def unif(k, shape, fan_in):
        bound = 1.0 / jnp.sqrt(fan_in)
        return jax.random.uniform(k, shape, jnp.float32, -bound, bound)

    w1 = unif(k1, (z_dim, N), z_dim)
    b1 = unif(k2, (1, N), z_dim)
    w2 = unif(k3, (N, N), N)
    b2 = unif(k4, (1, N), N)
    w3 = unif(k5, (1, N), N)      # stored as a row; logically (N, 1)
    b3 = unif(k6, (1, 1), N)
    return w1, b1, w2, b2, w3, b3


if __name__ == "__main__":
    B, z_dim, N = 8, 32, 256   # small stand-ins for z_dim, N=1000 (N kept a multiple of 128)

    key = jax.random.PRNGKey(0)
    kx, kp = jax.random.split(key)
    x = jax.random.normal(kx, (B, z_dim), jnp.float32)
    params = init_params(kp, z_dim, N)

    out = d_net_gauss(x, *params)
    out = jax.block_until_ready(out)
    assert out.shape == (B, 1)

    # Sanity check against a pure-JAX reference using the same bf16-weight path.
    w1, b1, w2, b2, w3, b3 = params
    h1 = jnp.maximum(
        jnp.dot(x.astype(jnp.bfloat16), w1.astype(jnp.bfloat16),
                preferred_element_type=jnp.float32) + b1, 0.0)
    h2 = jnp.maximum(
        jnp.dot(h1.astype(jnp.bfloat16), w2.astype(jnp.bfloat16),
                preferred_element_type=jnp.float32) + b2, 0.0)
    ref = jax.nn.sigmoid(h2 @ w3.T + b3)
    assert jnp.allclose(out, ref, atol=2e-2), "mismatch vs reference"

    print("KERNEL_OK")
</pallas_src>

<mosaic_0001>
module attributes {stable_mosaic.version = 11 : i64} {
  func.func @d_net_gauss_kernel(%arg0: i32, %arg1: memref<8x32xf32, #tpu.memory_space<vmem>>, %arg2: memref<32x256xbf16, #tpu.memory_space<vmem>>, %arg3: memref<1x256xf32, #tpu.memory_space<vmem>>, %arg4: memref<256x256xbf16, #tpu.memory_space<vmem>>, %arg5: memref<1x256xf32, #tpu.memory_space<vmem>>, %arg6: memref<1x256xf32, #tpu.memory_space<vmem>>, %arg7: memref<1x1xf32, #tpu.memory_space<smem>>, %arg8: memref<8x1xf32, #tpu.memory_space<vmem>>) attributes {dimension_semantics = [#tpu.dimension_semantics<parallel>], iteration_bounds = array<i64: 1>, scalar_prefetch = 0 : i64, scratch_operands = 0 : i64, tpu.core_type = #tpu.core_type<tc>, window_params = [{transform_indices = @transform_0, window_bounds = array<i64: 8, 32>}, {pipeline_mode = #tpu.pipeline_mode<synchronous>, transform_indices = @transform_1, window_bounds = array<i64: 32, 256>}, {pipeline_mode = #tpu.pipeline_mode<synchronous>, transform_indices = @transform_2, window_bounds = array<i64: 1, 256>}, {pipeline_mode = #tpu.pipeline_mode<synchronous>, transform_indices = @transform_3, window_bounds = array<i64: 256, 256>}, {pipeline_mode = #tpu.pipeline_mode<synchronous>, transform_indices = @transform_4, window_bounds = array<i64: 1, 256>}, {pipeline_mode = #tpu.pipeline_mode<synchronous>, transform_indices = @transform_5, window_bounds = array<i64: 1, 256>}, {transform_indices = @transform_6, window_bounds = array<i64: 1, 1>}, {transform_indices = @transform_7, window_bounds = array<i64: 8, 1>}]} {
    %c0 = arith.constant 0 : index
    %c0_0 = arith.constant 0 : index
    %0 = vector.load %arg1[%c0, %c0_0] : memref<8x32xf32, #tpu.memory_space<vmem>>, vector<8x32xf32>
    %1 = arith.truncf %0 : vector<8x32xf32> to vector<8x32xbf16>
    %c0_1 = arith.constant 0 : index
    %c0_2 = arith.constant 0 : index
    %2 = vector.load %arg2[%c0_1, %c0_2] : memref<32x256xbf16, #tpu.memory_space<vmem>>, vector<32x256xbf16>
    %cst = arith.constant dense<0.000000e+00> : vector<8x256xf32>
    %3 = tpu.matmul %1, %2, %cst {dimension_numbers = #tpu.dot_dimension_numbers<[1], [0], [0], [1], [0, 0, 1, 1], [], []>} : vector<8x32xbf16>, vector<32x256xbf16>, vector<8x256xf32> -> vector<8x256xf32>
    %c0_3 = arith.constant 0 : index
    %c0_4 = arith.constant 0 : index
    %4 = vector.load %arg3[%c0_3, %c0_4] : memref<1x256xf32, #tpu.memory_space<vmem>>, vector<1x256xf32>
    %5 = vector.broadcast %4 : vector<1x256xf32> to vector<8x256xf32>
    %6 = arith.addf %3, %5 : vector<8x256xf32>
    %cst_5 = arith.constant 0.000000e+00 : f32
    %7 = vector.broadcast %cst_5 : f32 to vector<8x256xf32>
    %8 = arith.maximumf %6, %7 : vector<8x256xf32>
    %9 = arith.truncf %8 : vector<8x256xf32> to vector<8x256xbf16>
    %c0_6 = arith.constant 0 : index
    %c0_7 = arith.constant 0 : index
    %10 = vector.load %arg4[%c0_6, %c0_7] : memref<256x256xbf16, #tpu.memory_space<vmem>>, vector<256x256xbf16>
    %cst_8 = arith.constant dense<0.000000e+00> : vector<8x256xf32>
    %11 = tpu.matmul %9, %10, %cst_8 {dimension_numbers = #tpu.dot_dimension_numbers<[1], [0], [0], [1], [0, 0, 1, 1], [], []>} : vector<8x256xbf16>, vector<256x256xbf16>, vector<8x256xf32> -> vector<8x256xf32>
    %c0_9 = arith.constant 0 : index
    %c0_10 = arith.constant 0 : index
    %12 = vector.load %arg5[%c0_9, %c0_10] : memref<1x256xf32, #tpu.memory_space<vmem>>, vector<1x256xf32>
    %13 = vector.broadcast %12 : vector<1x256xf32> to vector<8x256xf32>
    %14 = arith.addf %11, %13 : vector<8x256xf32>
    %cst_11 = arith.constant 0.000000e+00 : f32
    %15 = vector.broadcast %cst_11 : f32 to vector<8x256xf32>
    %16 = arith.maximumf %14, %15 : vector<8x256xf32>
    %c0_12 = arith.constant 0 : index
    %c0_13 = arith.constant 0 : index
    %17 = vector.load %arg6[%c0_12, %c0_13] : memref<1x256xf32, #tpu.memory_space<vmem>>, vector<1x256xf32>
    %18 = vector.broadcast %17 : vector<1x256xf32> to vector<8x256xf32>
    %19 = arith.mulf %16, %18 : vector<8x256xf32>
    %cst_14 = arith.constant dense<0.000000e+00> : vector<8xf32>
    %20 = vector.multi_reduction <add>, %19, %cst_14 [1] : vector<8x256xf32> to vector<8xf32>
    %21 = vector.shape_cast %20 : vector<8xf32> to vector<8x1xf32>
    %c0_15 = arith.constant 0 : index
    %c0_16 = arith.constant 0 : index
    %22 = memref.load %arg7[%c0_15, %c0_16] : memref<1x1xf32, #tpu.memory_space<smem>>
    %23 = vector.broadcast %22 : f32 to vector<8x1xf32>
    %24 = arith.addf %21, %23 : vector<8x1xf32>
    %cst_17 = arith.constant 0.000000e+00 : f32
    %25 = vector.broadcast %cst_17 : f32 to vector<8x1xf32>
    %26 = arith.subf %25, %24 : vector<8x1xf32>
    %27 = math.exp %26 : vector<8x1xf32>
    %cst_18 = arith.constant 1.000000e+00 : f32
    %28 = vector.broadcast %cst_18 : f32 to vector<8x1xf32>
    %29 = arith.addf %28, %27 : vector<8x1xf32>
    %30 = tpu.reciprocal %29 {approx = true} : vector<8x1xf32> -> vector<8x1xf32>
    %c0_19 = arith.constant 0 : index
    %c0_20 = arith.constant 0 : index
    %31 = vector.load %arg8[%c0_19, %c0_20] : memref<8x1xf32, #tpu.memory_space<vmem>>, vector<8x1xf32>
    tpu.vector_store %arg8[%c0_19, %c0_20], %30 {strides = array<i32>} : memref<8x1xf32, #tpu.memory_space<vmem>>, vector<8x1xf32>,
    return
  }
  func.func @transform_0(%arg0: i32) -> (i32, i32) {
    %c0_i32 = arith.constant 0 : i32
    %c0_i32_0 = arith.constant 0 : i32
    return %arg0, %c0_i32 : i32, i32
  }
  func.func @transform_1(%arg0: i32) -> (i32, i32) {
    %c0_i32 = arith.constant 0 : i32
    %c0_i32_0 = arith.constant 0 : i32
    %c0_i32_1 = arith.constant 0 : i32
    return %c0_i32, %c0_i32_0 : i32, i32
  }
  func.func @transform_2(%arg0: i32) -> (i32, i32) {
    %c0_i32 = arith.constant 0 : i32
    %c0_i32_0 = arith.constant 0 : i32
    %c0_i32_1 = arith.constant 0 : i32
    return %c0_i32, %c0_i32_0 : i32, i32
  }
  func.func @transform_3(%arg0: i32) -> (i32, i32) {
    %c0_i32 = arith.constant 0 : i32
    %c0_i32_0 = arith.constant 0 : i32
    %c0_i32_1 = arith.constant 0 : i32
    return %c0_i32, %c0_i32_0 : i32, i32
  }
  func.func @transform_4(%arg0: i32) -> (i32, i32) {
    %c0_i32 = arith.constant 0 : i32
    %c0_i32_0 = arith.constant 0 : i32
    %c0_i32_1 = arith.constant 0 : i32
    return %c0_i32, %c0_i32_0 : i32, i32
  }
  func.func @transform_5(%arg0: i32) -> (i32, i32) {
    %c0_i32 = arith.constant 0 : i32
    %c0_i32_0 = arith.constant 0 : i32
    %c0_i32_1 = arith.constant 0 : i32
    return %c0_i32, %c0_i32_0 : i32, i32
  }
  func.func @transform_6(%arg0: i32) -> (i32, i32) {
    %c0_i32 = arith.constant 0 : i32
    %c0_i32_0 = arith.constant 0 : i32
    %c0_i32_1 = arith.constant 0 : i32
    return %c0_i32, %c0_i32_0 : i32, i32
  }
  func.func @transform_7(%arg0: i32) -> (i32, i32) {
    %c0_i32 = arith.constant 0 : i32
    %c0_i32_0 = arith.constant 0 : i32
    return %arg0, %c0_i32 : i32, i32
  }
}

</mosaic_0001>

<bundles_post_ra>
// kernel: tpu_custom_call.1
= control target key start
LH: loop header
LB: loop body
LE: loop exit
PB: predicated region body
PF: predicated region fallthrough
CT: control target
= control target key end

     0   :  { %13 = vsyncpa [#allocation4], 0  ;;  %s888_s0 = inlined_call_operand.hbm [shape: f32[8,32], index: 0, kind: input, shape index: {}]   ;;  %s889_s1 = inlined_call_operand.hbm [shape: bf16[32,256], index: 1, kind: input, shape index: {}]   ;;  %s890_s2 = inlined_call_operand.hbm [shape: f32[1,256], index: 2, kind: input, shape index: {}]   ;;  %s891_s3 = inlined_call_operand.hbm [shape: bf16[256,256], index: 3, kind: input, shape index: {}]   ;;  %s892_s4 = inlined_call_operand.hbm [shape: f32[1,256], index: 4, kind: input, shape index: {}]   ;;  %s893_s5 = inlined_call_operand.hbm [shape: f32[1,256], index: 5, kind: input, shape index: {}]   ;;  %s894_s6 = inlined_call_operand.<no memory space> [shape: f32[1,1], index: 6, kind: input, shape index: {}]   ;;  %s895_s7 = inlined_call_operand.hbm [shape: f32[8,1], index: 7, kind: output, shape index: {}]  }
   0x1   :  { %14 = vsyncpa [#allocation7], 0 }
   0x2   :  { %15 = vsyncpa [#allocation10], 0 }
   0x3   :  { %16 = vsyncpa [#allocation13], 0 }
   0x4   :  { %17 = vsyncpa [#allocation5], 0  ;;  %s751_s24 = smov [#allocation6]   ;;  %s587_s28 = scalar_lea.hbm %s889_s1, 512 }
   0x5   :  { %s33_s25 = sshll.u32 %s751_s24, 4  ;;  %p588_p0 = scmp.ne.s32.totalorder %s889_s1, %s587_s28  ;;  %s34_s25 = int_to_ptr.vmem [resolvable:$true] %s33_s25 }
   0x6   :  { %p591_p1 = scmp.lt.u32.totalorder %s587_s28, %s889_s1 }
   0x8   :  { %p593_p2 = pnand %p591_p1, %p588_p0 }
   0xa   :  { %596 = shalt.err (!%p593_p2)
}
   0xb   :  { %s597_s10 = scalar_lea.vmem %s34_s25, 512  ;;  %p602_p4 = scmp.lt.s32.totalorder %s34_s25, %s34_s25 }
   0xc   :  { %p598_p3 = scmp.ne.s32.totalorder %s34_s25, %s597_s10  ;;  %p603_p5 = scmp.lt.s32.totalorder %s597_s10, %s597_s10 }
   0xe   :  { %p604_p6 = por %p603_p5, %p602_p4 }
  0x10   :  { %p605_p7 = pnand %p604_p6, %p598_p3 }
  0x12   :  { %608 = shalt.err (!%p605_p7)
}
  0x13   :  { %s752_s11 = smov 128   ;;  %s753_s12 = smov 8  }
  0x14   :  { %39 = dma.hbm_to_vmem [thread:$0]  %s889_s1, 512, %s34_s25, [#allocation7], %s752_s11, %s752_s11, %s753_s12  }
  0x15   :  { %s754_s15 = smov [#allocation9]   ;;  %s755_s17 = smov [#allocation3]  }
  0x16   :  { %s55_s16 = sshll.u32 %s754_s15, 4  ;;  %s24_s18 = sshll.u32 %s755_s17, 4  ;;  %s56_s16 = int_to_ptr.vmem [resolvable:$true] %s55_s16  ;;  %s25_s18 = int_to_ptr.vmem [resolvable:$true] %s24_s18 }
  0x17   :  { %s609_s21 = scalar_lea.hbm %s891_s3, 4096 }
  0x18   :  { %p610_p8 = scmp.ne.s32.totalorder %s891_s3, %s609_s21  ;;  %p613_p9 = scmp.lt.u32.totalorder %s609_s21, %s891_s3 }
  0x1a   :  { %p615_p10 = pnand %p613_p9, %p610_p8 }
  0x1c   :  { %618 = shalt.err (!%p615_p10)
}
  0x1d   :  { %s619_s1 = scalar_lea.vmem %s56_s16, 4096  ;;  %p624_p12 = scmp.lt.s32.totalorder %s56_s16, %s56_s16 }
  0x1e   :  { %p620_p11 = scmp.ne.s32.totalorder %s56_s16, %s619_s1  ;;  %p625_p13 = scmp.lt.s32.totalorder %s619_s1, %s619_s1 }
  0x20   :  { %p626_p0 = por %p625_p13, %p624_p12 }
  0x22   :  { %p627_p1 = pnand %p626_p0, %p620_p11 }
  0x24   :  { %630 = shalt.err (!%p627_p1)
}
  0x25   :  { %61 = dma.hbm_to_vmem [thread:$0]  %s891_s3, 4096, %s56_s16, [#allocation10], %s752_s11, %s752_s11, %s753_s12  }
  0x26   :  { %s631_s30 = scalar_lea.hbm %s888_s0, 128 }
  0x27   :  { %p632_p2 = scmp.ne.s32.totalorder %s888_s0, %s631_s30  ;;  %p635_p3 = scmp.lt.u32.totalorder %s631_s30, %s888_s0 }
  0x29   :  { %p637_p4 = pnand %p635_p3, %p632_p2 }
  0x2b   :  { %640 = shalt.err (!%p637_p4)
}
  0x2c   :  { %s641_s14 = scalar_lea.vmem %s25_s18, 128  ;;  %p646_p6 = scmp.lt.s32.totalorder %s25_s18, %s25_s18 }
  0x2d   :  { %p642_p5 = scmp.ne.s32.totalorder %s25_s18, %s641_s14  ;;  %p647_p7 = scmp.lt.s32.totalorder %s641_s14, %s641_s14 }
  0x2f   :  { %p648_p8 = por %p647_p7, %p646_p6 }
  0x31   :  { %p649_p9 = pnand %p648_p8, %p642_p5 }
  0x33   :  { %652 = shalt.err (!%p649_p9)
}
  0x34   :  { %27 = dma.hbm_to_vmem [thread:$0]  %s888_s0, 128, %s25_s18, [#allocation4]  }
  0x35   :  { %s756_s12 = smov [#allocation8]   ;;  %s757_s16 = smov [#allocation11]  }
  0x36   :  { %s46_s15 = sshll.u32 %s756_s12, 4  ;;  %s68_s17 = sshll.u32 %s757_s16, 4  ;;  %s47_s15 = int_to_ptr.vmem [resolvable:$true] %s46_s15  ;;  %s69_s17 = int_to_ptr.vmem [resolvable:$true] %s68_s17 }
  0x37   :  { %s653_s21 = scalar_lea.hbm %s890_s2, 32 }
  0x38   :  { %p654_p10 = scmp.ne.s32.totalorder %s890_s2, %s653_s21  ;;  %p657_p11 = scmp.lt.u32.totalorder %s653_s21, %s890_s2 }
  0x3a   :  { %p659_p12 = pnand %p657_p11, %p654_p10 }
  0x3c   :  { %662 = shalt.err (!%p659_p12)
}
  0x3d   :  { %s663_s0 = scalar_lea.vmem %s47_s15, 32  ;;  %p668_p0 = scmp.lt.s32.totalorder %s47_s15, %s47_s15 }
  0x3e   :  { %p664_p13 = scmp.ne.s32.totalorder %s47_s15, %s663_s0  ;;  %p669_p1 = scmp.lt.s32.totalorder %s663_s0, %s663_s0 }
  0x40   :  { %p670_p2 = por %p669_p1, %p668_p0 }
  0x42   :  { %p671_p3 = pnand %p670_p2, %p664_p13 }
  0x44   :  { %674 = shalt.err (!%p671_p3)
}
  0x45   :  { %49 = dma.hbm_to_vmem [thread:$0]  %s890_s2, 32, %s47_s15, [#allocation7]  }
  0x46   :  { %s675_s28 = scalar_lea.hbm %s892_s4, 32 }
  0x47   :  { %p676_p4 = scmp.ne.s32.totalorder %s892_s4, %s675_s28  ;;  %p679_p5 = scmp.lt.u32.totalorder %s675_s28, %s892_s4 }
  0x49   :  { %p681_p6 = pnand %p679_p5, %p676_p4 }
  0x4b   :  { %684 = shalt.err (!%p681_p6)
}
  0x4c   :  { %s685_s10 = scalar_lea.vmem %s69_s17, 32  ;;  %p690_p8 = scmp.lt.s32.totalorder %s69_s17, %s69_s17 }
  0x4d   :  { %p686_p7 = scmp.ne.s32.totalorder %s69_s17, %s685_s10  ;;  %p691_p9 = scmp.lt.s32.totalorder %s685_s10, %s685_s10 }
  0x4f   :  { %p692_p10 = por %p691_p9, %p690_p8 }
  0x51   :  { %p693_p11 = pnand %p692_p10, %p686_p7 }
  0x53   :  { %696 = shalt.err (!%p693_p11)
}
  0x54   :  { %71 = dma.hbm_to_vmem [thread:$0]  %s892_s4, 32, %s69_s17, [#allocation10]  }
  0x55   :  { %s758_s14 = smov [#allocation12]   ;;  %s697_s15 = scalar_lea.hbm %s893_s5, 32 }
  0x56   :  { %s78_s3 = sshll.u32 %s758_s14, 4  ;;  %p698_p12 = scmp.ne.s32.totalorder %s893_s5, %s697_s15  ;;  %s79_s3 = int_to_ptr.vmem [resolvable:$true] %s78_s3 }
  0x57   :  { %p701_p13 = scmp.lt.u32.totalorder %s697_s15, %s893_s5 }
  0x59   :  { %p703_p0 = pnand %p701_p13, %p698_p12 }
  0x5b   :  { %706 = shalt.err (!%p703_p0)
}
  0x5c   :  { %s707_s22 = scalar_lea.vmem %s79_s3, 32  ;;  %p712_p2 = scmp.lt.s32.totalorder %s79_s3, %s79_s3 }
  0x5d   :  { %p708_p1 = scmp.ne.s32.totalorder %s79_s3, %s707_s22  ;;  %p713_p3 = scmp.lt.s32.totalorder %s707_s22, %s707_s22 }
  0x5f   :  { %p714_p4 = por %p713_p3, %p712_p2 }
  0x61   :  { %p715_p5 = pnand %p714_p4, %p708_p1 }
  0x63   :  { %718 = shalt.err (!%p715_p5)
}
  0x64   :  { %81 = dma.hbm_to_vmem [thread:$0]  %s893_s5, 32, %s79_s3, [#allocation13]  }
  0x65   :  { %741 = dma.done.wait [#allocation4], 128  }
  0x66   :  { %742 = vsyncadd [#allocation4], 4294967168 }
  0x67   :  { %743 = dma.done.wait [#allocation7], 544  }
  0x68   :  { %744 = vsyncadd [#allocation7], 4294966752 }
  0x69   :  { %745 = dma.done.wait [#allocation10], 4128  }
  0x6a   :  { %746 = vsyncadd [#allocation10], 4294963168 }
  0x6b   :  { %747 = dma.done.wait [#allocation13], 32  }
  0x6c   :  { %748 = vsyncadd [#allocation13], 4294967264  ;;  %v759_v0 = vmov 0   ;;  %v529_v1 = vld [vmem:[#allocation6 + $0x4] ss:$8 sps:$4 sm:$0xff]   ;;  %v103_v5 = vld [vmem:[#allocation3] sm:$0xff]  ;;  %v111_v39 = vlaneseq }
  0x6d   :  { %177 = vmatprep.mubr.bf16.mxu0 %v759_v0  ;;  %v531_v2 = vld [vmem:[#allocation6] ss:$8 sps:$4 sm:$0xff]   ;;  %145 = vmatprep.subr.bf16.mxu0 %v529_v1  ;;  %v532_v3 = vld [vmem:[#allocation6 + $0x14] ss:$8 sps:$4 sm:$0xff]   ;;  %v534_v4 = vld [vmem:[#allocation6 + $0x10] ss:$8 sps:$4 sm:$0xff]   ;;  %v104_v9 = vpack.c.bf16 %v103_v5, %v103_v5 }
  0x6e   :  { %146 = vmatpush1.bf16.msra.mxu0 %v531_v2  ;;  %v535_v6 = vld [vmem:[#allocation9 + $0x4] ss:$8 sps:$4 sm:$0xff]   ;;  %v537_v7 = vld [vmem:[#allocation9] ss:$8 sps:$4 sm:$0xff]   ;;  %v538_v8 = vld [vmem:[#allocation9 + $0x14] ss:$8 sps:$4 sm:$0xff]  }
  0x6f   :  { %147 = vmatprep.subr.bf16.mxu0 %v532_v3  ;;  %394 = vmatprep.subr.bf16.mxu1 %v535_v6  ;;  %v540_v10 = vld [vmem:[#allocation9 + $0x10] ss:$8 sps:$4 sm:$0xff]   ;;  %vm141_vm0 = vcmask 261120   ;;  %v541_v11 = vld [vmem:[#allocation9 + $0x24] ss:$8 sps:$4 sm:$0xff]   ;;  %v112_v40 = vshrl.u32 %v111_v39, 7 }
  0x70   :  { %395 = vmatpush1.bf16.msra.mxu1 %v537_v7  ;;  %v543_v12 = vld [vmem:[#allocation9 + $0x20] ss:$8 sps:$4 sm:$0xff]   ;;  %v544_v13 = vld [vmem:[#allocation9 + $0x34] ss:$8 sps:$4 sm:$0xff]   ;;  %v546_v14 = vld [vmem:[#allocation9 + $0x30] ss:$8 sps:$4 sm:$0xff]  }
  0x71   :  { %396 = vmatprep.subr.bf16.mxu1 %v538_v8  ;;  %v547_v15 = vld [vmem:[#allocation9 + $0x44] ss:$8 sps:$4 sm:$0xff]   ;;  %v549_v16 = vld [vmem:[#allocation9 + $0x40] ss:$8 sps:$4 sm:$0xff]   ;;  %v550_v17 = vld [vmem:[#allocation9 + $0x54] ss:$8 sps:$4 sm:$0xff]  }
  0x72   :  { %148 = vmatpush1.bf16.msra.mxu0 %v534_v4  ;;  %v552_v18 = vld [vmem:[#allocation9 + $0x50] ss:$8 sps:$4 sm:$0xff]   ;;  %v553_v19 = vld [vmem:[#allocation9 + $0x64] ss:$8 sps:$4 sm:$0xff]   ;;  %v555_v20 = vld [vmem:[#allocation9 + $0x60] ss:$8 sps:$4 sm:$0xff]  }
  0x73   :  { %v556_v21 = vld [vmem:[#allocation9 + $0x74] ss:$8 sps:$4 sm:$0xff]   ;;  %v558_v22 = vld [vmem:[#allocation9 + $0x70] ss:$8 sps:$4 sm:$0xff]   ;;  %v559_v23 = vld [vmem:[#allocation9 + $0x84] ss:$8 sps:$4 sm:$0xff]  }
  0x74   :  { %397 = vmatpush1.bf16.msra.mxu1 %v540_v10  ;;  %v561_v24 = vld [vmem:[#allocation9 + $0x80] ss:$8 sps:$4 sm:$0xff]   ;;  %v562_v25 = vld [vmem:[#allocation9 + $0x94] ss:$8 sps:$4 sm:$0xff]   ;;  %v564_v26 = vld [vmem:[#allocation9 + $0x90] ss:$8 sps:$4 sm:$0xff]  }
  0x75   :  { %486 = vmatmul.mubr.msk.bf16.vlgmr.msra.gmra.mrb[0].mxu0 %vm141_vm0, %v104_v9  ;;  %398 = vmatprep.subr.bf16.mxu1 %v541_v11  ;;  %v565_v27 = vld [vmem:[#allocation9 + $0xa4] ss:$8 sps:$4 sm:$0xff]   ;;  %v567_v28 = vld [vmem:[#allocation9 + $0xa0] ss:$8 sps:$4 sm:$0xff]   ;;  %v568_v29 = vld [vmem:[#allocation9 + $0xb4] ss:$8 sps:$4 sm:$0xff]   ;;  %v455_v9 = vstv %s894_s6 }
  0x76   :  { %v570_v30 = vld [vmem:[#allocation9 + $0xb0] ss:$8 sps:$4 sm:$0xff]   ;;  %v571_v31 = vld [vmem:[#allocation9 + $0xc4] ss:$8 sps:$4 sm:$0xff]   ;;  %v573_v32 = vld [vmem:[#allocation9 + $0xc0] ss:$8 sps:$4 sm:$0xff]  }
  0x77   :  { %v574_v33 = vld [vmem:[#allocation9 + $0xd4] ss:$8 sps:$4 sm:$0xff]   ;;  %v576_v34 = vld [vmem:[#allocation9 + $0xd0] ss:$8 sps:$4 sm:$0xff]   ;;  %v577_v35 = vld [vmem:[#allocation9 + $0xe4] ss:$8 sps:$4 sm:$0xff]  }
  0x78   :  { %399 = vmatpush1.bf16.msra.mxu1 %v543_v12  ;;  %v579_v36 = vld [vmem:[#allocation9 + $0xe0] ss:$8 sps:$4 sm:$0xff]   ;;  %v580_v37 = vld [vmem:[#allocation9 + $0xf4] ss:$8 sps:$4 sm:$0xff]   ;;  %v582_v38 = vld [vmem:[#allocation9 + $0xf0] ss:$8 sps:$4 sm:$0xff]  }
  0x79   :  { %400 = vmatprep.subr.bf16.mxu1 %v544_v13  ;;  %v113_v41 = vsub.s32 0, %v112_v40  ;;  %v109_v42 = vld [vmem:[#allocation8] sm:$0x3]  ;;  %v117_v43 = vsub.s32 1, %v112_v40  ;;  %v222_v56 = vld [vmem:[#allocation11] sm:$0x3] }
  0x7a   :  { %v437_v59 = vld [vmem:[#allocation12] sm:$0x3]  ;;  %s760_s24 = smov [#allocation14]   ;;  %vm462_vm1 = vcmask 7168  }
  0x7b   :  { %v114_v44 = vrot.slane %v109_v42, %v113_v41  ;;  %v118_v45 = vrot.slane %v109_v42, %v117_v43  ;;  %v227_v57 = vrot.slane %v222_v56, %v113_v41  ;;  %v231_v58 = vrot.slane %v222_v56, %v117_v43  ;;  %s470_s26 = sshll.u32 %s760_s24, 4  ;;  %s471_s26 = int_to_ptr.vmem [resolvable:$true] %s470_s26 }
  0x7c   :  { %401 = vmatpush1.bf16.msra.mxu1 %v546_v14  ;;  %v442_v63 = vrot.slane %v437_v59, %v113_v41  ;;  %v446_v2 = vrot.slane %v437_v59, %v117_v43  ;;  %s719_s0 = scalar_lea.vmem %s471_s26, 128  ;;  %p724_p7 = scmp.lt.s32.totalorder %s471_s26, %s471_s26 }
  0x7d   :  { %402 = vmatprep.subr.bf16.mxu1 %v547_v15  ;;  %p720_p6 = scmp.ne.s32.totalorder %s471_s26, %s719_s0  ;;  %p725_p8 = scmp.lt.s32.totalorder %s719_s0, %s719_s0 }
  0x7f   :  { %p726_p9 = por %p725_p8, %p724_p7 }
  0x80   :  { %403 = vmatpush1.bf16.msra.mxu1 %v549_v16 }
  0x81   :  { %404 = vmatprep.subr.bf16.mxu1 %v550_v17  ;;  %p727_p10 = pnand %p726_p9, %p720_p6 }
  0x84   :  { %405 = vmatpush1.bf16.msra.mxu1 %v552_v18 }
  0x85   :  { %406 = vmatprep.subr.bf16.mxu1 %v553_v19 }
  0x88   :  { %407 = vmatpush1.bf16.msra.mxu1 %v555_v20 }
  0x89   :  { %408 = vmatprep.subr.bf16.mxu1 %v556_v21 }
  0x8c   :  { %409 = vmatpush1.bf16.msra.mxu1 %v558_v22 }
  0x8d   :  { %410 = vmatprep.subr.bf16.mxu1 %v559_v23 }
  0x90   :  { %411 = vmatpush1.bf16.msra.mxu1 %v561_v24 }
  0x91   :  { %412 = vmatprep.subr.bf16.mxu1 %v562_v25 }
  0x94   :  { %413 = vmatpush1.bf16.msra.mxu1 %v564_v26 }
  0x95   :  { %414 = vmatprep.subr.bf16.mxu1 %v565_v27 }
  0x98   :  { %415 = vmatpush1.bf16.msra.mxu1 %v567_v28 }
  0x99   :  { %416 = vmatprep.subr.bf16.mxu1 %v568_v29 }
  0x9c   :  { %417 = vmatpush1.bf16.msra.mxu1 %v570_v30 }
  0x9d   :  { %418 = vmatprep.subr.bf16.mxu1 %v571_v31 }
  0xa0   :  { %419 = vmatpush1.bf16.msra.mxu1 %v573_v32 }
  0xa1   :  { %420 = vmatprep.subr.bf16.mxu1 %v574_v33 }
  0xa4   :  { %421 = vmatpush1.bf16.msra.mxu1 %v576_v34 }
  0xa5   :  { %422 = vmatprep.subr.bf16.mxu1 %v577_v35 }
  0xa8   :  { %423 = vmatpush1.bf16.msra.mxu1 %v579_v36 }
  0xa9   :  { %424 = vmatprep.subr.bf16.mxu1 %v580_v37 }
  0xac   :  { %425 = vmatpush1.bf16.msra.mxu1 %v582_v38 }
 0x148   :  { %v179_v46 = vpop.f32.mrb[0].mxu0 }
 0x149   :  { %v180_v47 = vadd.f32 %v179_v46, %v114_v44  ;;  %v181_v48 = vpop.f32.mrb[1].mxu0 }
 0x14a   :  { %v182_v49 = vadd.f32 %v181_v48, %v118_v45  ;;  %v183_v50 = vpop.f32.mrb[2].mxu0 }
 0x14b   :  { %v186_v51 = vmax.f32 %v180_v47, 0.0  ;;  %v184_v52 = vpop.f32.mrb[3].mxu0 }
 0x14c   :  { %v187_v53 = vmax.f32 %v182_v49, 0.0 }
 0x14d   :  { %v188_v55 = vpack.c.bf16 %v186_v51, %v186_v51 }
 0x14e   :  { %v189_v54 = vpack.c.bf16 %v187_v53, %v187_v53 }
 0x150   :  { %426 = vmatprep.mubr.bf16.mxu1 %v189_v54 }
 0x151   :  { %427 = vmatmul.mubr.bf16.vlgmr.msra.gmra.mrb[0].mxu1 %v188_v55 }
 0x224   :  { %v428_v60 = vpop.f32.mrb[0].mxu1 }
 0x225   :  { %v429_v61 = vadd.f32 %v428_v60, %v227_v57  ;;  %v430_v62 = vpop.f32.mrb[1].mxu1 }
 0x226   :  { %v431_v0 = vadd.f32 %v430_v62, %v231_v58  ;;  %v432_v1 = vpop.f32.mrb[2].mxu1 }
 0x227   :  { %v435_v3 = vmax.f32 %v429_v61, 0.0  ;;  %v433_v4 = vpop.f32.mrb[3].mxu1 }
 0x228   :  { %v436_v5 = vmax.f32 %v431_v0, 0.0 }
 0x229   :  { %v449_v6 = vmul.f32 %v442_v63, %v435_v3 }
 0x22a   :  { %v450_v7 = vmul.f32 %v446_v2, %v436_v5 }
 0x22c   :  { %v451_v8 = vadd.f32 %v450_v7, %v449_v6 }
 0x22e   :  { %452 = vadd.xlane.f32.xlu0 %v451_v8 }
 0x2bb   :  { %v453_v10 = vpop.xlane.xlu0 %452 }
 0x2bc   :  { %v456_v11 = vadd.f32 %v455_v9, %v453_v10 }
 0x2be   :  { %v457_v12 = vsub.f32 0.0, %v456_v11 }
 0x2c0   :  { %v458_v13 = vmul.f32 1.442695, %v457_v12 }
 0x2c2   :  { %583 = vpow2.f32 %v458_v13 }
 0x2cc   :  { %v584_v14 = vpop.eup %583 }
 0x2cd   :  { %v460_v15 = vadd.f32 1.0, %v584_v14 }
 0x2cf   :  { %585 = vrcp.f32 %v460_v15 }
 0x2d9   :  { %v586_v16 = vpop.eup %585 }
 0x2da   :  { %463 = vst.msk [vmem:[#allocation14] sm:$0xff] %vm462_vm1, %v586_v16 }
 0x2db   :  { %730 = shalt.err (!%p727_p10)
}
 0x2dc   :  { %s731_s1 = scalar_lea.hbm %s895_s7, 128 }
 0x2dd   :  { %p732_p11 = scmp.ne.s32.totalorder %s895_s7, %s731_s1  ;;  %p735_p12 = scmp.lt.u32.totalorder %s731_s1, %s895_s7 }
 0x2df   :  { %p737_p13 = pnand %p735_p12, %p732_p11 }
 0x2e1   :  { %740 = shalt.err (!%p737_p13)
}
 0x2e2   :  { %473 = dma.vmem_to_hbm [thread:$0]  %s471_s26, 128, %s895_s7, [#allocation5]  }
 0x2e3   :  { %749 = dma.done.wait [#allocation5], 128  }
 0x2e4   :  { %750 = vsyncadd [#allocation5], 4294967168 }
 0x2e5   :  { %477 = vsyncpa [#allocation4], 1 }
 0x2e6   :  { %478 = vsyncpa [#allocation7], 1 }
 0x2e7   :  { %479 = vsyncpa [#allocation10], 1 }
 0x2e8   :  { %480 = vsyncpa [#allocation13], 1 }
 0x2e9   :  { %481 = vsyncpa [#allocation5], 1 }

</bundles_post_ra>
